<compile_context>
chip_gen: v7x
topology: tpu7x:2x2x1
jax: 0.10.0
libtpu: 0.0.40
codegen_flags: <defaults>
</compile_context>

<pallas_src>
import functools

import jax
import jax.numpy as jnp
from jax.experimental import pallas as pl
from jax.experimental.pallas import tpu as pltpu

LANE = 128  # lane-dense padded width for Cout / Ncls


# ---------------------------------------------------------------------------
# Fused kernel (per grid step = `ipb` images):
#   patches: [ipb*H*W, K]    bf16   (K = 9*Cin)
#   w_conv : [K, 128]        bf16   (Cout zero-padded to 128)
#   b_conv : [1, 128]        f32
#   w_head : [128, 128]      bf16   (Cout x Ncls, zero-padded)
#   b_head : [1, 128]        f32
#   out    : [1, ipb, 128]   f32    (padded logits rows for this step)
# ---------------------------------------------------------------------------
def fused_classifier_kernel(patches_ref, wconv_ref, bconv_ref,
                            whead_ref, bhead_ref, out_ref):
    # conv-as-matmul on the MXU, bf16 inputs, f32 accumulation.
    acc = jnp.dot(patches_ref[...], wconv_ref[...],
                  preferred_element_type=jnp.float32)          # [ipb*HW, 128] f32
    acc = jnp.maximum(acc + bconv_ref[...], 0.0)               # bias + ReLU (f32)

    # Per-image global average pool: exact-f32 sublane sum (VPU adds + one
    # cross-sublane XLU reduce) instead of an f32xf32 MXU matmul.
    ipb = out_ref.shape[1]
    hw = acc.shape[0] // ipb
    pooled = jnp.sum(acc.reshape(ipb, hw, LANE), axis=1) * (1.0 / hw)  # [ipb,128]

    # Linear head (bf16 MXU inputs, f32 accumulate) + bias.
    logits = jnp.dot(pooled.astype(jnp.bfloat16), whead_ref[...],
                     preferred_element_type=jnp.float32)       # [ipb, 128]
    logits = logits + bhead_ref[...]

    out_ref[...] = logits.reshape(out_ref.shape)               # lane-dense store


def im2col_3x3_same(x_nhwc):
    """Extract 3x3 same-padding patches. Returns [N*H*W, 9*Cin] (image-major)."""
    n, h, w, c = x_nhwc.shape
    xp = jnp.pad(x_nhwc, ((0, 0), (1, 1), (1, 1), (0, 0)))
    cols = []
    for dy in range(3):
        for dx in range(3):
            cols.append(xp[:, dy:dy + h, dx:dx + w, :])
    patches = jnp.concatenate(cols, axis=-1)          # [N, H, W, 9*Cin]
    return patches.reshape(n * h * w, 9 * c)


def prepare_params(params):
    """Zero-pad Cout / Ncls to the 128-lane width; cast matmul weights to bf16."""
    w_conv, b_conv, w_head, b_head = params
    k, cout = w_conv.shape
    _, ncls = w_head.shape

    w_conv_p = jnp.zeros((k, LANE), jnp.float32).at[:, :cout].set(w_conv)
    b_conv_p = jnp.zeros((1, LANE), jnp.float32).at[:, :cout].set(b_conv)
    w_head_p = jnp.zeros((LANE, LANE), jnp.float32).at[:cout, :ncls].set(w_head)
    b_head_p = jnp.zeros((1, LANE), jnp.float32).at[:, :ncls].set(b_head)

    return (w_conv_p.astype(jnp.bfloat16), b_conv_p,
            w_head_p.astype(jnp.bfloat16), b_head_p)


def classifier_forward(x_nchw, padded_params, *, ncls):
    """Forward pass equivalent of net(xs) with the synthetic backbone.

    `ncls` must be a static Python int (bound via functools.partial, not a
    traced argument) so the final slice is static.
    """
    w_conv, b_conv, w_head, b_head = padded_params
    n, cin, h, w = x_nchw.shape
    hw = h * w
    k = w_conv.shape[0]                                # 9 * Cin

    # At most 2 fat grid steps: amortize per-step overhead on v5e/v6e while
    # keeping both v7x TensorCores busy.
    num_blocks = 2 if (n >= 2 and n % 2 == 0) else 1
    ipb = n // num_blocks                              # images per grid step

    x_nhwc = jnp.transpose(x_nchw, (0, 2, 3, 1)).astype(jnp.float32)
    patches = im2col_3x3_same(x_nhwc).astype(jnp.bfloat16)     # [N*H*W, K] bf16

    flops = 2 * n * hw * k * LANE + 2 * n * LANE * LANE
    bytes_accessed = (patches.size * 2          # bf16 patches
                      + w_conv.size * 2 + w_head.size * 2      # bf16 weights
                      + b_conv.size * 4 + b_head.size * 4      # f32 biases
                      + num_blocks * ipb * LANE * 4)           # f32 logits slab

    logits_padded = pl.pallas_call(
        fused_classifier_kernel,
        out_shape=jax.ShapeDtypeStruct((num_blocks, ipb, LANE), jnp.float32),
        grid=(num_blocks,),
        in_specs=[
            # ipb images' worth of im2col rows per grid step
            pl.BlockSpec((ipb * hw, k), lambda i: (i, 0)),
            # weights / biases: constant index_map -> stay VMEM-resident
            pl.BlockSpec((k, LANE), lambda i: (0, 0)),
            pl.BlockSpec((1, LANE), lambda i: (0, 0)),
            pl.BlockSpec((LANE, LANE), lambda i: (0, 0)),
            pl.BlockSpec((1, LANE), lambda i: (0, 0)),
        ],
        out_specs=pl.BlockSpec((1, ipb, LANE), lambda i: (i, 0, 0)),
        compiler_params=pltpu.CompilerParams(
            dimension_semantics=("parallel",),
            vmem_limit_bytes=32 * 1024 * 1024),
        cost_estimate=pl.CostEstimate(
            flops=flops, transcendentals=0, bytes_accessed=bytes_accessed),
    )(patches, w_conv, b_conv, w_head, b_head)

    return logits_padded.reshape(n, LANE)[:, :ncls]    # static slice -> [N, Ncls]


def reference_forward(x_nchw, params):
    """Pure-JAX f32 reference (conv3x3 same -> ReLU -> GAP -> linear)."""
    w_conv, b_conv, w_head, b_head = params
    n, cin, h, w = x_nchw.shape
    x_nhwc = jnp.transpose(x_nchw, (0, 2, 3, 1)).astype(jnp.float32)
    patches = im2col_3x3_same(x_nhwc)                           # [N*H*W, 9*Cin]
    act = jnp.maximum(patches @ w_conv + b_conv, 0.0)           # [N*H*W, Cout]
    pooled = act.reshape(n, h * w, -1).mean(axis=1)             # [N, Cout]
    return pooled @ w_head + b_head                             # [N, Ncls]


def init_params(key, cin=4, cout=8, ncls=10):
    k1, k2, k3, k4 = jax.random.split(key, 4)
    # conv weight laid out as [ky*kx*Cin, Cout] to match im2col ordering.
    w_conv = jax.random.normal(k1, (9 * cin, cout), jnp.float32) * 0.1
    b_conv = jax.random.normal(k2, (1, cout), jnp.float32) * 0.1
    w_head = jax.random.normal(k3, (cout, ncls), jnp.float32) * 0.1
    b_head = jax.random.normal(k4, (1, ncls), jnp.float32) * 0.1
    return w_conv, b_conv, w_head, b_head


if __name__ == "__main__":
    key = jax.random.PRNGKey(0)
    k_in, k_p = jax.random.split(key)

    # NCHW input, matching the PyTorch convention.
    x = jax.random.normal(k_in, (2, 4, 16, 16), jnp.float32)
    params = init_params(k_p, cin=4, cout=8, ncls=10)
    padded_params = prepare_params(params)
    ncls = params[2].shape[1]                          # static Python int (10)

    fwd = jax.jit(functools.partial(classifier_forward, ncls=ncls))
    logits = fwd(x, padded_params)
    jax.block_until_ready(logits)

    assert logits.shape == (2, ncls)
    assert jnp.all(jnp.isfinite(logits))

    # Loose tolerance: bf16 MXU inputs vs. f32 reference (~1e-3 abs expected).
    ref = reference_forward(x, params)
    assert jnp.allclose(logits, ref, atol=5e-2, rtol=5e-2)

    print("KERNEL_OK")
</pallas_src>

<mosaic_0001>
module attributes {stable_mosaic.version = 11 : i64} {
  func.func @fused_classifier_kernel(%arg0: i32, %arg1: memref<256x36xbf16, #tpu.memory_space<vmem>>, %arg2: memref<36x128xbf16, #tpu.memory_space<vmem>>, %arg3: memref<1x128xf32, #tpu.memory_space<vmem>>, %arg4: memref<128x128xbf16, #tpu.memory_space<vmem>>, %arg5: memref<1x128xf32, #tpu.memory_space<vmem>>, %arg6: memref<1x1x128xf32, #tpu.memory_space<vmem>>) attributes {dimension_semantics = [#tpu.dimension_semantics<parallel>], iteration_bounds = array<i64: 2>, scalar_prefetch = 0 : i64, scratch_operands = 0 : i64, tpu.core_type = #tpu.core_type<tc>, window_params = [{transform_indices = @transform_0, window_bounds = array<i64: 256, 36>}, {pipeline_mode = #tpu.pipeline_mode<synchronous>, transform_indices = @transform_1, window_bounds = array<i64: 36, 128>}, {pipeline_mode = #tpu.pipeline_mode<synchronous>, transform_indices = @transform_2, window_bounds = array<i64: 1, 128>}, {pipeline_mode = #tpu.pipeline_mode<synchronous>, transform_indices = @transform_3, window_bounds = array<i64: 128, 128>}, {pipeline_mode = #tpu.pipeline_mode<synchronous>, transform_indices = @transform_4, window_bounds = array<i64: 1, 128>}, {transform_indices = @transform_5, window_bounds = array<i64: 1, 1, 128>}]} {
    %c0 = arith.constant 0 : index
    %c0_0 = arith.constant 0 : index
    %0 = vector.load %arg1[%c0, %c0_0] : memref<256x36xbf16, #tpu.memory_space<vmem>>, vector<256x36xbf16>
    %c0_1 = arith.constant 0 : index
    %c0_2 = arith.constant 0 : index
    %1 = vector.load %arg2[%c0_1, %c0_2] : memref<36x128xbf16, #tpu.memory_space<vmem>>, vector<36x128xbf16>
    %cst = arith.constant dense<0.000000e+00> : vector<256x128xf32>
    %2 = tpu.matmul %0, %1, %cst {dimension_numbers = #tpu.dot_dimension_numbers<[1], [0], [0], [1], [0, 0, 1, 1], [], []>} : vector<256x36xbf16>, vector<36x128xbf16>, vector<256x128xf32> -> vector<256x128xf32>
    %c0_3 = arith.constant 0 : index
    %c0_4 = arith.constant 0 : index
    %3 = vector.load %arg3[%c0_3, %c0_4] : memref<1x128xf32, #tpu.memory_space<vmem>>, vector<1x128xf32>
    %4 = vector.broadcast %3 : vector<1x128xf32> to vector<256x128xf32>
    %5 = arith.addf %2, %4 : vector<256x128xf32>
    %cst_5 = arith.constant 0.000000e+00 : f32
    %6 = vector.broadcast %cst_5 : f32 to vector<256x128xf32>
    %7 = arith.maximumf %5, %6 : vector<256x128xf32>
    %8 = vector.shape_cast %7 : vector<256x128xf32> to vector<1x256x128xf32>
    %cst_6 = arith.constant dense<0.000000e+00> : vector<1x128xf32>
    %9 = vector.multi_reduction <add>, %8, %cst_6 [1] : vector<1x256x128xf32> to vector<1x128xf32>
    %cst_7 = arith.constant 3.906250e-03 : f32
    %10 = vector.broadcast %cst_7 : f32 to vector<1x128xf32>
    %11 = arith.mulf %9, %10 : vector<1x128xf32>
    %12 = arith.truncf %11 : vector<1x128xf32> to vector<1x128xbf16>
    %c0_8 = arith.constant 0 : index
    %c0_9 = arith.constant 0 : index
    %13 = vector.load %arg4[%c0_8, %c0_9] : memref<128x128xbf16, #tpu.memory_space<vmem>>, vector<128x128xbf16>
    %cst_10 = arith.constant dense<0.000000e+00> : vector<1x128xf32>
    %14 = tpu.matmul %12, %13, %cst_10 {dimension_numbers = #tpu.dot_dimension_numbers<[1], [0], [0], [1], [0, 0, 1, 1], [], []>} : vector<1x128xbf16>, vector<128x128xbf16>, vector<1x128xf32> -> vector<1x128xf32>
    %c0_11 = arith.constant 0 : index
    %c0_12 = arith.constant 0 : index
    %15 = vector.load %arg5[%c0_11, %c0_12] : memref<1x128xf32, #tpu.memory_space<vmem>>, vector<1x128xf32>
    %16 = arith.addf %14, %15 : vector<1x128xf32>
    %17 = vector.shape_cast %16 : vector<1x128xf32> to vector<1x1x128xf32>
    %c0_13 = arith.constant 0 : index
    %c0_14 = arith.constant 0 : index
    %c0_15 = arith.constant 0 : index
    %18 = vector.load %arg6[%c0_13, %c0_14, %c0_15] : memref<1x1x128xf32, #tpu.memory_space<vmem>>, vector<1x1x128xf32>
    tpu.vector_store %arg6[%c0_13, %c0_14, %c0_15], %17 {strides = array<i32>} : memref<1x1x128xf32, #tpu.memory_space<vmem>>, vector<1x1x128xf32>,
    return
  }
  func.func @transform_0(%arg0: i32) -> (i32, i32) {
    %c0_i32 = arith.constant 0 : i32
    %c0_i32_0 = arith.constant 0 : i32
    return %arg0, %c0_i32 : i32, i32
  }
  func.func @transform_1(%arg0: i32) -> (i32, i32) {
    %c0_i32 = arith.constant 0 : i32
    %c0_i32_0 = arith.constant 0 : i32
    %c0_i32_1 = arith.constant 0 : i32
    return %c0_i32, %c0_i32_0 : i32, i32
  }
  func.func @transform_2(%arg0: i32) -> (i32, i32) {
    %c0_i32 = arith.constant 0 : i32
    %c0_i32_0 = arith.constant 0 : i32
    %c0_i32_1 = arith.constant 0 : i32
    return %c0_i32, %c0_i32_0 : i32, i32
  }
  func.func @transform_3(%arg0: i32) -> (i32, i32) {
    %c0_i32 = arith.constant 0 : i32
    %c0_i32_0 = arith.constant 0 : i32
    %c0_i32_1 = arith.constant 0 : i32
    return %c0_i32, %c0_i32_0 : i32, i32
  }
  func.func @transform_4(%arg0: i32) -> (i32, i32) {
    %c0_i32 = arith.constant 0 : i32
    %c0_i32_0 = arith.constant 0 : i32
    %c0_i32_1 = arith.constant 0 : i32
    return %c0_i32, %c0_i32_0 : i32, i32
  }
  func.func @transform_5(%arg0: i32) -> (i32, i32, i32) {
    %c0_i32 = arith.constant 0 : i32
    %c0_i32_0 = arith.constant 0 : i32
    %c0_i32_1 = arith.constant 0 : i32
    return %arg0, %c0_i32, %c0_i32_0 : i32, i32, i32
  }
}

</mosaic_0001>

<bundles_post_ra>
// kernel: classifier_forward.1
= control target key start
LH: loop header
LB: loop body
LE: loop exit
PB: predicated region body
PF: predicated region fallthrough
CT: control target
= control target key end

     0   :  { %10 = vsyncpa [#allocation3], 0  ;;  %s1334_s0 = inlined_call_operand.vmem [shape: bf16[512,36], index: 0, kind: input, shape index: {}]   ;;  %s1335_s1 = inlined_call_operand.vmem [shape: bf16[36,128], index: 1, kind: input, shape index: {}]   ;;  %s1336_s2 = inlined_call_operand.vmem [shape: f32[1,128], index: 2, kind: input, shape index: {}]   ;;  %s1337_s3 = inlined_call_operand.vmem [shape: bf16[128,128], index: 3, kind: input, shape index: {}]   ;;  %s1338_s4 = inlined_call_operand.vmem [shape: f32[1,128], index: 4, kind: input, shape index: {}]   ;;  %s1339_s5 = inlined_call_operand.hbm [shape: f32[2,1,128], index: 5, kind: output, shape index: {}]  }
   0x1   :  { %12 = vsyncpa [#allocation3 + $0x1], 0  ;;  %s1128_s18 = smov 0   ;;  %s1130_s19 = smov 0  }
   0x2   :  { %s1132_s20 = smov 0   ;;  %s1134_s21 = smov 0  }
   0x3 LB: > { %s1149_s22 = sadd.s32 4294967295, %s1093_s21   ;;  %s823_s23 = sadd.s32 4294967294, %s1093_s21   ;;  %s1093_s21 = sphi %s1134_s21, %s1345_s21   ;;  %s1089_s20 = sphi %s1132_s20, %s1344_s20   ;;  %s1085_s19 = sphi %s1130_s19, %s1343_s19   ;;  %s1081_s18 = sphi %s1128_s18, %s1342_s18  }
   0x4   : > { %s1153_s24 = sadd.s32 1, %s1093_s21   ;;  %s135_s25 = sadd.s32 1, %s1089_s20 }
   0x5   : > { %s132_s26 = ssub.s32 %s1093_s21, %s1153_s24  ;;  %p145_p0 = scmp.ne.s32.totalorder %s1089_s20, %s1085_s19 }
   0x6   : > { %p133_p1 = scmp.eq.s32.totalorder %s132_s26, 0  ;;  %p146_p2 = scmp.eq.s32.totalorder %s1149_s22, 1 }
   0x7   : > { %p151_p3 = scmp.ne.s32.totalorder %s1085_s19, %s1081_s18  ;;  %p152_p4 = scmp.eq.s32.totalorder %s823_s23, 1 }
   0x8   : > { %s1164_s27 = scalar_select %p133_p1, %s1089_s20, %s135_s25  }
   0x9   : > { %p1166_p5 = por %p146_p2, %p145_p0  ;;  %p1170_p6 = por %p152_p4, %p151_p3 }
   0xa   : > { %p826_p7 = scmp.ge.s32.totalorder %s1093_s21, 1  ;;  %p191_p8 = scmp.lt.s32.totalorder %s1093_s21, 3 }
   0xc   : > { %p192_p9 = pnand %p826_p7, %p191_p8 }
   0xd   : > { %v1004_v0 = vld [vmem:[%s1335_s1] sm:$0xff] (!%p192_p9)   ;;  %v1005_v1 = vld [vmem:[%s1335_s1 + $0x8] sm:$0xff] (!%p192_p9)   ;;  %s827_s9 = sshll.u32 (!%p192_p9), %s1149_s22, 5  ;;  %v1006_v2 = vld [vmem:[%s1335_s1 + $0x10] ss:$0 sps:$4 sm:$0x33] (!%p192_p9)  }
   0xe   : > { %195 = sbr.rel (%p192_p9) target bundleno = 551 (0x227), region = 40  ;;  %904 = vmatprep.subr.bf16.mxu0 (!%p192_p9), %v1004_v0  ;;  %p219_p10 = scmp.lt.s32.totalorder (!%p192_p9), %s827_s9, 63  ;;  %vm413_vm0 = vcmask (!%p192_p9), 1041408   ;;  %vm364_vm1 = vcmask (!%p192_p9), 293888   ;;  %v1023_v20 = vld [vmem:[%s1337_s3] sm:$0xff] (!%p192_p9)   ;;  %v1095_v21 = vmov (!%p192_p9), 0.0  }
   0xf   : > { %905 = vmatpush3.bf16.msra.mxu0 (!%p192_p9), %v1004_v0  ;;  %v415_v3 = vsel (!%p192_p9), %vm413_vm0, %v1006_v2, 0  ;;  %942 = vmatprep.subr.bf16.mxu1 (!%p192_p9), %v1095_v21  ;;  %v1024_v22 = vld [vmem:[%s1337_s3 + $0x8] sm:$0xff] (!%p192_p9)   ;;  %v1025_v23 = vld [vmem:[%s1337_s3 + $0x10] sm:$0xff] (!%p192_p9)   ;;  %v1026_v24 = vld [vmem:[%s1337_s3 + $0x18] sm:$0xff] (!%p192_p9)   ;;  %vm1096_vm2 = vmmov (!%p192_p9), 0   ;;  %s216_s23 = sand.u32 (!%p192_p9), 1, %s1085_s19  }
  0x10   : > { %906 = vmatprep.subr.bf16.mxu0 (!%p192_p9), %v1005_v1  ;;  %943 = vmatpush3.bf16.msra.mxu1 (!%p192_p9), %v1023_v20  ;;  %v1027_v25 = vld [vmem:[%s1337_s3 + $0x20] sm:$0xff] (!%p192_p9)   ;;  %v1028_v26 = vld [vmem:[%s1337_s3 + $0x28] sm:$0xff] (!%p192_p9)   ;;  %v1029_v27 = vld [vmem:[%s1337_s3 + $0x30] sm:$0xff] (!%p192_p9)   ;;  %s873_s30 = sshll.u32 (!%p192_p9), %s1149_s22, 4  ;;  %s217_s6 = scalar_lea.vmem (!%p192_p9), [#allocation2], %s216_s23 }
  0x11   : > { %944 = vmatprep.subr.bf16.mxu1 (!%p192_p9), %v1095_v21  ;;  %958 = vmatprep.mubr.msk.bf16.mxu1 (!%p192_p9), %vm1096_vm2, %v1095_v21  ;;  %v1030_v28 = vld [vmem:[%s1337_s3 + $0x38] sm:$0xff] (!%p192_p9)   ;;  %v1250_v29 = vld [vmem:[%s1336_s2] ss:$0 sm:$0xff] (!%p192_p9)  ;;  %s768_s7 = sshll.u32 (!%p192_p9), %s217_s6, 4  ;;  %s1292_s10 = scalar_lea.hbm (!%p192_p9), %s1339_s5, %s873_s30  ;;  %s1294_s7 = int_to_ptr.vmem [resolvable:$true] %s768_s7 }
  0x12   : > { %s756_s11 = scalar_lea.sflag (!%p192_p9), [#allocation3], %s216_s23  ;;  %s1031_s22 = scalar_lea.vmem (!%p192_p9), %s1294_s7, 16 }
  0x13   : > { %907 = vmatpush3.bf16.msra.mxu0 (!%p192_p9), %v1005_v1  ;;  %p1032_p11 = scmp.ne.s32.totalorder (!%p192_p9), %s1294_s7, %s1031_s22 }
  0x14   : > { %962 = vmatprep.subr.msk.bf16.mxu0 (!%p192_p9), %vm413_vm0, %v1006_v2  ;;  %945 = vmatpush3.bf16.msra.mxu1 (!%p192_p9), %v1024_v22 }
  0x15   : > { %s1347_s9 = smov (!%p219_p10, %s827_s9), 63  ;;  %946 = vmatprep.subr.bf16.mxu1 %v1095_v21  ;;  %p1033_p12 = pnand %p1032_p11, %p1166_p5 }
  0x16   : > { %s828_s12 = sshll.u32 %s1347_s9, 2 }
  0x17   : > { %s1189_s15 = scalar_lea.vmem %s1334_s0, %s828_s12  ;;  %909 = vmatpush3.bf16.msra.mxu0 %v415_v3  ;;  %p1034_p13 = pneg %p1033_p12 }
  0x18   : > { %v1007_v4 = vld [vmem:[%s1189_s15] sm:$0xff]   ;;  %v1008_v5 = vld [vmem:[%s1189_s15 + $0x8] sm:$0xff]   ;;  %v1009_v6 = vld [vmem:[%s1189_s15 + $0x10] sm:$0xff]   ;;  %947 = vmatpush3.bf16.msra.mxu1 %v1025_v23  ;;  %s1097_s12 = smov [#allocation2]  }
  0x19   : > { %910 = vmatprep.mubr.msk.bf16.mxu0 %vm364_vm1, %v1007_v4  ;;  %v1010_v7 = vld [vmem:[%s1189_s15 + $0x18] sm:$0xff]   ;;  %v1011_v8 = vld [vmem:[%s1189_s15 + $0x20] sm:$0xff]   ;;  %v1012_v9 = vld [vmem:[%s1189_s15 + $0x28] sm:$0xff]   ;;  %948 = vmatprep.subr.bf16.mxu1 %v1095_v21  ;;  %s1035_s13 = sshll.u32 %s1097_s12, 4  ;;  %s1036_s13 = int_to_ptr.vmem [resolvable:$false] %s1035_s13 }
  0x1a   : > { %911 = vmatmul.mubr.msk.bf16.vlgmr.msra.gmra.mrb[0].mxu0 %vm364_vm1, %v1008_v5  ;;  %v1013_v10 = vld [vmem:[%s1189_s15 + $0x30] sm:$0xff]   ;;  %v1014_v11 = vld [vmem:[%s1189_s15 + $0x38] sm:$0xff]   ;;  %v1015_v12 = vld [vmem:[%s1189_s15 + $0x40] sm:$0xff]   ;;  %s1037_s14 = scalar_lea.vmem %s1036_s13, 32  ;;  %p1038_p0 = scmp.lt.s32.totalorder %s1294_s7, %s1036_s13 }
  0x1b   : > { %914 = vmatprep.mubr.msk.bf16.mxu0 %vm364_vm1, %v1009_v6  ;;  %v1016_v13 = vld [vmem:[%s1189_s15 + $0x48] sm:$0xff]   ;;  %v1017_v14 = vld [vmem:[%s1189_s15 + $0x50] sm:$0xff]   ;;  %v1018_v15 = vld [vmem:[%s1189_s15 + $0x58] sm:$0xff]   ;;  %p1039_p1 = scmp.lt.s32.totalorder %s1037_s14, %s1031_s22 }
  0x1c   : > { %v1019_v16 = vld [vmem:[%s1189_s15 + $0x60] sm:$0xff]   ;;  %v1020_v17 = vld [vmem:[%s1189_s15 + $0x68] sm:$0xff]   ;;  %v1021_v18 = vld [vmem:[%s1189_s15 + $0x70] sm:$0xff]   ;;  %949 = vmatpush3.bf16.msra.mxu1 %v1026_v24 }
  0x1d   : > { %v1022_v19 = vld [vmem:[%s1189_s15 + $0x78] sm:$0xff]   ;;  %950 = vmatprep.subr.bf16.mxu1 %v1095_v21  ;;  %p1040_p2 = por %p1039_p1, %p1038_p0 }
  0x1f   : > { %p1041_p3 = pnand %p1040_p2, %p1034_p13 }
  0x20   : > { %951 = vmatpush3.bf16.msra.mxu1 %v1027_v25 }
  0x21   : > { %952 = vmatprep.subr.bf16.mxu1 %v1095_v21 }
  0x22   : > { %915 = vmatmul.mubr.msk.bf16.gmra.mrb[4].mxu0 %vm364_vm1, %v1010_v7 }
  0x23   : > { %918 = vmatprep.mubr.msk.bf16.mxu0 %vm364_vm1, %v1011_v8 }
  0x24   : > { %953 = vmatpush3.bf16.msra.mxu1 %v1028_v26 }
  0x25   : > { %954 = vmatprep.subr.bf16.mxu1 %v1095_v21 }
  0x28   : > { %955 = vmatpush3.bf16.msra.mxu1 %v1029_v27 }
  0x29   : > { %956 = vmatprep.subr.bf16.mxu1 %v1095_v21 }
  0x2a   : > { %919 = vmatmul.mubr.msk.bf16.gmra.mrb[8].mxu0 %vm364_vm1, %v1012_v9 }
  0x2b   : > { %922 = vmatprep.mubr.msk.bf16.mxu0 %vm364_vm1, %v1013_v10 }
  0x2c   : > { %957 = vmatpush3.bf16.msra.mxu1 %v1030_v28 }
  0x32   : > { %923 = vmatmul.mubr.msk.bf16.gmra.mrb[12].mxu0 %vm364_vm1, %v1014_v11 }
  0x33   : > { %926 = vmatprep.mubr.msk.bf16.mxu0 %vm364_vm1, %v1015_v12 }
  0x3a   : > { %927 = vmatmul.mubr.msk.bf16.gmra.mrb[16].mxu0 %vm364_vm1, %v1016_v13 }
  0x3b   : > { %930 = vmatprep.mubr.msk.bf16.mxu0 %vm364_vm1, %v1017_v14 }
  0x42   : > { %931 = vmatmul.mubr.msk.bf16.gmra.mrb[20].mxu0 %vm364_vm1, %v1018_v15 }
  0x43   : > { %934 = vmatprep.mubr.msk.bf16.mxu0 %vm364_vm1, %v1019_v16 }
  0x4a   : > { %935 = vmatmul.mubr.msk.bf16.gmra.mrb[24].mxu0 %vm364_vm1, %v1020_v17 }
  0x4b   : > { %938 = vmatprep.mubr.msk.bf16.mxu0 %vm364_vm1, %v1021_v18 }
  0x52   : > { %939 = vmatmul.mubr.msk.bf16.gmra.mrb[28].mxu0 %vm364_vm1, %v1022_v19 }
  0xed   : > { %v912_v30 = vpop.f32.mrb[0].mxu0 }
  0xee   : > { %v451_v31 = vpop.f32.mrb[1].mxu0  ;;  %v460_v35 = vadd.f32 %v912_v30, %v1250_v29 }
  0xef   : > { %v452_v32 = vadd.f32 %v1250_v29, %v451_v31  ;;  %v913_v33 = vpop.f32.mrb[2].mxu0 }
  0xf0   : > { %v454_v34 = vpop.f32.mrb[3].mxu0  ;;  %v463_v38 = vadd.f32 %v913_v33, %v1250_v29  ;;  %v580_v40 = vmax.f32 %v460_v35, 0.0 }
  0xf1   : > { %v455_v36 = vadd.f32 %v1250_v29, %v454_v34  ;;  %v578_v37 = vmax.f32 %v452_v32, 0.0 }
  0xf2   : > { %v581_v44 = vmax.f32 %v463_v38, 0.0 }
  0xf3   : > { %v579_v39 = vmax.f32 %v455_v36, 0.0 }
  0xf5   : > { %v610_v41 = vadd.f32 %v579_v39, %v578_v37  ;;  %v916_v42 = vpop.f32.mrb[4].mxu0 }
  0xf6   : > { %v467_v43 = vpop.f32.mrb[5].mxu0  ;;  %v476_v49 = vadd.f32 %v916_v42, %v1250_v29 }
  0xf7   : > { %v611_v45 = vadd.f32 %v610_v41, %v580_v40  ;;  %v468_v46 = vadd.f32 %v1250_v29, %v467_v43  ;;  %v917_v47 = vpop.f32.mrb[6].mxu0 }
  0xf8   : > { %v470_v48 = vpop.f32.mrb[7].mxu0  ;;  %v479_v54 = vadd.f32 %v917_v47, %v1250_v29  ;;  %v584_v56 = vmax.f32 %v476_v49, 0.0 }
  0xf9   : > { %v582_v50 = vmax.f32 %v468_v46, 0.0  ;;  %v612_v51 = vadd.f32 %v611_v45, %v581_v44  ;;  %v471_v52 = vadd.f32 %v1250_v29, %v470_v48 }
  0xfa   : > { %v585_v60 = vmax.f32 %v479_v54, 0.0 }
  0xfb   : > { %v613_v53 = vadd.f32 %v612_v51, %v582_v50  ;;  %v583_v55 = vmax.f32 %v471_v52, 0.0 }
  0xfd   : > { %v614_v57 = vadd.f32 %v613_v53, %v583_v55  ;;  %v920_v58 = vpop.f32.mrb[8].mxu0 }
  0xfe   : > { %v483_v59 = vpop.f32.mrb[9].mxu0  ;;  %v492_v1 = vadd.f32 %v920_v58, %v1250_v29 }
  0xff   : > { %v615_v61 = vadd.f32 %v614_v57, %v584_v56  ;;  %v484_v62 = vadd.f32 %v1250_v29, %v483_v59  ;;  %v921_v63 = vpop.f32.mrb[10].mxu0 }
 0x100   : > { %v486_v0 = vpop.f32.mrb[11].mxu0  ;;  %v495_v6 = vadd.f32 %v921_v63, %v1250_v29  ;;  %v588_v8 = vmax.f32 %v492_v1, 0.0 }
 0x101   : > { %v586_v2 = vmax.f32 %v484_v62, 0.0  ;;  %v616_v3 = vadd.f32 %v615_v61, %v585_v60  ;;  %v487_v4 = vadd.f32 %v1250_v29, %v486_v0 }
 0x102   : > { %v589_v12 = vmax.f32 %v495_v6, 0.0 }
 0x103   : > { %v617_v5 = vadd.f32 %v616_v3, %v586_v2  ;;  %v587_v7 = vmax.f32 %v487_v4, 0.0 }
 0x105   : > { %v618_v9 = vadd.f32 %v617_v5, %v587_v7  ;;  %v924_v10 = vpop.f32.mrb[12].mxu0 }
 0x106   : > { %v499_v11 = vpop.f32.mrb[13].mxu0  ;;  %v508_v17 = vadd.f32 %v924_v10, %v1250_v29 }
 0x107   : > { %v619_v13 = vadd.f32 %v618_v9, %v588_v8  ;;  %v500_v14 = vadd.f32 %v1250_v29, %v499_v11  ;;  %v925_v15 = vpop.f32.mrb[14].mxu0 }
 0x108   : > { %v502_v16 = vpop.f32.mrb[15].mxu0  ;;  %v511_v22 = vadd.f32 %v925_v15, %v1250_v29  ;;  %v592_v24 = vmax.f32 %v508_v17, 0.0 }
 0x109   : > { %v590_v18 = vmax.f32 %v500_v14, 0.0  ;;  %v620_v19 = vadd.f32 %v619_v13, %v589_v12  ;;  %v503_v20 = vadd.f32 %v1250_v29, %v502_v16 }
 0x10a   : > { %v593_v28 = vmax.f32 %v511_v22, 0.0 }
 0x10b   : > { %v621_v21 = vadd.f32 %v620_v19, %v590_v18  ;;  %v591_v23 = vmax.f32 %v503_v20, 0.0 }
 0x10d   : > { %v622_v25 = vadd.f32 %v621_v21, %v591_v23  ;;  %v928_v26 = vpop.f32.mrb[16].mxu0 }
 0x10e   : > { %v515_v27 = vpop.f32.mrb[17].mxu0  ;;  %v524_v34 = vadd.f32 %v928_v26, %v1250_v29 }
 0x10f   : > { %v623_v30 = vadd.f32 %v622_v25, %v592_v24  ;;  %v516_v31 = vadd.f32 %v1250_v29, %v515_v27  ;;  %v929_v32 = vpop.f32.mrb[18].mxu0 }
 0x110   : > { %v518_v33 = vpop.f32.mrb[19].mxu0  ;;  %v527_v39 = vadd.f32 %v929_v32, %v1250_v29  ;;  %v596_v41 = vmax.f32 %v524_v34, 0.0 }
 0x111   : > { %v594_v35 = vmax.f32 %v516_v31, 0.0  ;;  %v624_v36 = vadd.f32 %v623_v30, %v593_v28  ;;  %v519_v37 = vadd.f32 %v1250_v29, %v518_v33 }
 0x112   : > { %v597_v45 = vmax.f32 %v527_v39, 0.0 }
 0x113   : > { %v625_v38 = vadd.f32 %v624_v36, %v594_v35  ;;  %v595_v40 = vmax.f32 %v519_v37, 0.0 }
 0x115   : > { %v626_v42 = vadd.f32 %v625_v38, %v595_v40  ;;  %v932_v43 = vpop.f32.mrb[20].mxu0 }
 0x116   : > { %v531_v44 = vpop.f32.mrb[21].mxu0  ;;  %v540_v50 = vadd.f32 %v932_v43, %v1250_v29 }
 0x117   : > { %v627_v46 = vadd.f32 %v626_v42, %v596_v41  ;;  %v532_v47 = vadd.f32 %v1250_v29, %v531_v44  ;;  %v933_v48 = vpop.f32.mrb[22].mxu0 }
 0x118   : > { %v534_v49 = vpop.f32.mrb[23].mxu0  ;;  %v543_v55 = vadd.f32 %v933_v48, %v1250_v29  ;;  %v600_v57 = vmax.f32 %v540_v50, 0.0 }
 0x119   : > { %v598_v51 = vmax.f32 %v532_v47, 0.0  ;;  %v628_v52 = vadd.f32 %v627_v46, %v597_v45  ;;  %v535_v53 = vadd.f32 %v1250_v29, %v534_v49 }
 0x11a   : > { %v601_v61 = vmax.f32 %v543_v55, 0.0 }
 0x11b   : > { %v629_v54 = vadd.f32 %v628_v52, %v598_v51  ;;  %v599_v56 = vmax.f32 %v535_v53, 0.0 }
 0x11d   : > { %v630_v58 = vadd.f32 %v629_v54, %v599_v56  ;;  %v936_v59 = vpop.f32.mrb[24].mxu0 }
 0x11e   : > { %v547_v60 = vpop.f32.mrb[25].mxu0  ;;  %v556_v2 = vadd.f32 %v936_v59, %v1250_v29 }
 0x11f   : > { %v631_v62 = vadd.f32 %v630_v58, %v600_v57  ;;  %v548_v63 = vadd.f32 %v1250_v29, %v547_v60  ;;  %v937_v0 = vpop.f32.mrb[26].mxu0 }
 0x120   : > { %v550_v1 = vpop.f32.mrb[27].mxu0  ;;  %v559_v7 = vadd.f32 %v937_v0, %v1250_v29  ;;  %v604_v9 = vmax.f32 %v556_v2, 0.0 }
 0x121   : > { %v602_v3 = vmax.f32 %v548_v63, 0.0  ;;  %v632_v4 = vadd.f32 %v631_v62, %v601_v61  ;;  %v551_v5 = vadd.f32 %v1250_v29, %v550_v1 }
 0x122   : > { %v605_v13 = vmax.f32 %v559_v7, 0.0 }
 0x123   : > { %v633_v6 = vadd.f32 %v632_v4, %v602_v3  ;;  %v603_v8 = vmax.f32 %v551_v5, 0.0 }
 0x125   : > { %v634_v10 = vadd.f32 %v633_v6, %v603_v8  ;;  %v940_v11 = vpop.f32.mrb[28].mxu0 }
 0x126   : > { %v563_v12 = vpop.f32.mrb[29].mxu0  ;;  %v572_v18 = vadd.f32 %v940_v11, %v1250_v29 }
 0x127   : > { %v635_v14 = vadd.f32 %v634_v10, %v604_v9  ;;  %v564_v15 = vadd.f32 %v1250_v29, %v563_v12  ;;  %v941_v16 = vpop.f32.mrb[30].mxu0 }
 0x128   : > { %v566_v17 = vpop.f32.mrb[31].mxu0  ;;  %v575_v23 = vadd.f32 %v941_v16, %v1250_v29  ;;  %v608_v25 = vmax.f32 %v572_v18, 0.0 }
 0x129   : > { %v606_v19 = vmax.f32 %v564_v15, 0.0  ;;  %v636_v20 = vadd.f32 %v635_v14, %v605_v13  ;;  %v567_v21 = vadd.f32 %v1250_v29, %v566_v17  ;;  %v665_v29 = vld [vmem:[%s1338_s4] sm:$0x1] }
 0x12a   : > { %v609_v27 = vmax.f32 %v575_v23, 0.0 }
 0x12b   : > { %v637_v22 = vadd.f32 %v636_v20, %v606_v19  ;;  %v607_v24 = vmax.f32 %v567_v21, 0.0 }
 0x12d   : > { %v638_v26 = vadd.f32 %v637_v22, %v607_v24 }
 0x12f   : > { %v639_v28 = vadd.f32 %v638_v26, %v608_v25 }
 0x131   : > { %v640_v30 = vadd.f32 %v639_v28, %v609_v27 }
 0x133   : > { %v641_v31 = vrot.slane %v640_v30, 4 }
 0x135   : > { %v642_v32 = vadd.f32 %v641_v31, %v640_v30 }
 0x137   : > { %v643_v33 = vrot.slane %v642_v32, 2 }
 0x139   : > { %v644_v34 = vadd.f32 %v643_v33, %v642_v32 }
 0x13b   : > { %v645_v35 = vrot.slane %v644_v34, 1 }
 0x13d   : > { %v646_v36 = vadd.f32 %v645_v35, %v644_v34 }
 0x13f   : > { %v647_v37 = vmul.f32 0.00390625, %v646_v36 }
 0x141   : > { %v648_v38 = vpack.c.bf16 %v647_v37, %v647_v37 }
 0x143   : > { %959 = vmatmul.mubr.bf16.vlgmr.msra.gmra.mrb[0].mxu1 %v648_v38 }
 0x216   : > { %v748_v39 = vpop.f32.mrb[0].mxu1 }
 0x217   : > { %v749_v40 = vadd.f32 %v748_v39, %v665_v29  ;;  %v960_v41 = vpop.f32.mrb[1].mxu1 }
 0x218   : > { %v751_v42 = vpop.f32.mrb[2].mxu1 }
 0x219   : > { %754 = vst [vmem:[%s217_s6] sm:$0x1] %v749_v40  ;;  %v961_v43 = vpop.f32.mrb[3].mxu1 }
 0x21a   : > { %1044 = shalt.err (!%p1041_p3)
}
 0x21b   : > { %s1045_s15 = scalar_lea.hbm %s1292_s10, 16  ;;  %s1049_s23 = scalar_lea.hbm %s1339_s5, 32 }
 0x21c   : > { %p1046_p4 = scmp.ne.s32.totalorder %s1292_s10, %s1045_s15  ;;  %p1050_p9 = scmp.lt.u32.totalorder %s1292_s10, %s1339_s5 }
 0x21d   : > { %p1051_p10 = scmp.lt.u32.totalorder %s1049_s23, %s1045_s15  ;;  %p1053_p12 = scmp.lt.u32.totalorder %s1045_s15, %s1292_s10 }
 0x21e   : > { %p1047_p7 = pnand %p1046_p4, %p1166_p5 }
 0x21f   : > { %p1052_p11 = por %p1051_p10, %p1050_p9 }
 0x220   : > { %p1048_p8 = pneg %p1047_p7 }
 0x221   : > { %p1054_p13 = por %p1053_p12, %p1052_p11 }
 0x223   : > { %p1055_p0 = pnand %p1054_p13, %p1048_p8 }
 0x225   : > { %1058 = shalt.err (!%p1055_p0)
}
 0x226   : > { %963 = dma.vmem_to_hbm [thread:$0]  (%p1166_p5), %s1294_s7, 16, %s1292_s10, %s756_s11  }
 0x227 PF: > { %p969_p1 = scmp.ge.s32.totalorder %s1093_s21, 2  ;;  %s780_s30 = sand.u32 1, %s1081_s18  }
 0x228   : > { %s781_s6 = scalar_lea.sflag [#allocation3], %s780_s30 }
 0x229   : > { %p966_p2 = pnand %p969_p1, %p1170_p6 }
 0x22b   : > { %1076 = dma.done.wait (!%p966_p2), %s781_s6, 16  }
 0x22c   : > { %1078 = vsyncadd (!%p966_p2), %s781_s6, 4294967280  ;;  %p15_p3 = scmp.ge.s32.totalorder %s1153_s24, 4   ;;  %s1342_s18 = smov %s1085_s19 }
 0x22d   : > { %s1343_s19 = smov %s1089_s20  ;;  %s1344_s20 = smov %s1164_s27 }
 0x22e   : > { %s1345_s21 = smov %s1153_s24  ;;  %17 = sbr.rel (!%p15_p3) target bundleno = 3 (0x3), region = 75 }
 0x235   :  { %785 = vsyncpa [#allocation3], 1 }
 0x236   :  { %787 = vsyncpa [#allocation3 + $0x1], 1 }

</bundles_post_ra>
